<compile_context>
chip_gen: v7x
topology: tpu7x:2x2x1
jax: 0.10.0
libtpu: 0.0.40
codegen_flags: <defaults>
</compile_context>

<pallas_src>
import math

import jax
import jax.numpy as jnp
from jax.experimental import pallas as pl
from jax.experimental.pallas import tpu as pltpu


_INV_SQRT2 = 1.0 / math.sqrt(2.0)


def _round_up(a, b):
    return (a + b - 1) // b * b


def _vmem_limit_bytes():
    """Scoped-VMEM limit derived from the chip's physical VMEM, with headroom."""
    cap = None
    try:
        info = pltpu.get_tpu_info()
        cap = getattr(info, "vmem_capacity_bytes", None)
    except Exception:
        cap = None
    if not cap:
        cap = 64 * 1024 * 1024  # conservative: v7x per-TensorCore VMEM
    headroom = 8 * 1024 * 1024
    return max(32 * 1024 * 1024, min(int(cap) - headroom, 112 * 1024 * 1024))


def _pick_tiles(m, dim_pad, hidden, tm_req, th_req, in_isz, out_isz, vmem_limit):
    """Choose (tm, th) that fill the MXU but fit the VMEM budget."""
    tm = min(_round_up(tm_req, 8), _round_up(m, 8))
    th = min(_round_up(th_req, 128), _round_up(hidden, 128))

    def est(tm_, th_):
        weights = 2 * 2 * dim_pad * th_ * in_isz       # W1 + W2 slices, double-buffered
        xin = 2 * tm_ * dim_pad * in_isz                # x tile, double-buffered
        out = 2 * tm_ * dim_pad * out_isz               # output tile, double-buffered
        acc = tm_ * dim_pad * 4                         # f32 accumulator scratch
        hid = tm_ * th_ * 4                             # f32 hidden activation temporary
        bias = 2 * 2 * (th_ + dim_pad) * in_isz         # b1/b2 slices
        return weights + xin + out + acc + hid + bias

    budget = int(vmem_limit * 0.75)
    while est(tm, th) > budget and th > 128:
        th = max(128, _round_up(th // 2, 128))
    while est(tm, th) > budget and tm > 128:
        tm = max(128, _round_up(max(tm // 2, 8), 8))
    return tm, th


def mlp_kernel(x_ref, w1_ref, b1_ref, w2_ref, b2_ref, o_ref, acc_ref):
    # x_ref:  (tm, dim_pad)      row tile, native dtype
    # w1_ref: (dim_pad, th)      hidden-slice of W1 (pre-transposed vs torch (out, in))
    # b1_ref: (1, th)
    # w2_ref: (th, dim_pad)      hidden-slice of W2
    # b2_ref: (1, dim_pad)
    # o_ref:  (tm, dim_pad)      resident across the hidden axis
    # acc_ref:(tm, dim_pad) f32  scratch accumulator
    h_idx = pl.program_id(1)

    @pl.when(h_idx == 0)
    def _():
        acc_ref[...] = jnp.zeros_like(acc_ref)

    # First linear (partial over hidden columns): native-dtype MXU, f32 accumulation.
    h = jnp.dot(x_ref[...], w1_ref[...], preferred_element_type=jnp.float32)
    h = h + b1_ref[...].astype(jnp.float32)

    # Exact (erf-based) GELU in f32 — matches torch.nn.GELU() default.
    h = 0.5 * h * (1.0 + jax.lax.erf(h * jnp.float32(_INV_SQRT2)))

    # Second linear (partial over hidden rows): accumulate into f32 scratch.
    acc_ref[...] += jnp.dot(h.astype(w2_ref.dtype), w2_ref[...],
                            preferred_element_type=jnp.float32)

    @pl.when(h_idx == pl.num_programs(1) - 1)
    def _():
        o_ref[...] = (acc_ref[...] + b2_ref[...].astype(jnp.float32)).astype(o_ref.dtype)


def mlp_pallas(x, w1, b1, w2, b2, *, tm=256, th=512):
    """x: (..., dim). w1: (dim, hidden), b1: (hidden,), w2: (hidden, dim), b2: (dim,)."""
    orig_shape = x.shape
    dim = orig_shape[-1]
    hidden = w1.shape[1]

    x2d = x.reshape(-1, dim)
    m = x2d.shape[0]

    in_isz = jnp.dtype(x.dtype).itemsize
    out_isz = in_isz
    vmem_limit = _vmem_limit_bytes()

    # Lane-dense last dims (multiples of 128); zero padding is exact and sliced off.
    dim_pad = _round_up(max(dim, 1), 128)

    tm_eff, th_eff = _pick_tiles(m, dim_pad, hidden, tm, th, in_isz, out_isz, vmem_limit)
    m_pad = _round_up(m, tm_eff)
    hidden_pad = _round_up(hidden, th_eff)

    if m_pad != m or dim_pad != dim:
        x2d = jnp.pad(x2d, ((0, m_pad - m), (0, dim_pad - dim)))
    w1p = jnp.pad(w1, ((0, dim_pad - dim), (0, hidden_pad - hidden))) \
        if (dim_pad != dim or hidden_pad != hidden) else w1
    w2p = jnp.pad(w2, ((0, hidden_pad - hidden), (0, dim_pad - dim))) \
        if (dim_pad != dim or hidden_pad != hidden) else w2
    b1p = jnp.pad(b1.reshape(1, hidden), ((0, 0), (0, hidden_pad - hidden)))
    b2p = jnp.pad(b2.reshape(1, dim), ((0, 0), (0, dim_pad - dim)))

    grid = (m_pad // tm_eff, hidden_pad // th_eff)

    cost = pl.CostEstimate(
        flops=2 * 2 * m_pad * dim_pad * hidden_pad,          # two matmuls
        transcendentals=m_pad * hidden_pad,                  # erf in GELU
        bytes_accessed=int(
            m_pad * dim_pad * (in_isz + out_isz)             # x in + y out
            + w1p.size * in_isz + w2p.size * in_isz
            + b1p.size * in_isz + b2p.size * in_isz),
    )

    out = pl.pallas_call(
        mlp_kernel,
        out_shape=jax.ShapeDtypeStruct((m_pad, dim_pad), x.dtype),
        grid_spec=pltpu.PrefetchScalarGridSpec(
            num_scalar_prefetch=0,
            grid=grid,
            in_specs=[
                pl.BlockSpec((tm_eff, dim_pad), lambda i, h: (i, 0)),   # x row tile
                pl.BlockSpec((dim_pad, th_eff), lambda i, h: (0, h)),   # W1 hidden slice
                pl.BlockSpec((1, th_eff), lambda i, h: (0, h)),         # b1 slice
                pl.BlockSpec((th_eff, dim_pad), lambda i, h: (h, 0)),   # W2 hidden slice
                pl.BlockSpec((1, dim_pad), lambda i, h: (0, 0)),        # b2 (invariant)
            ],
            out_specs=pl.BlockSpec((tm_eff, dim_pad), lambda i, h: (i, 0)),
            scratch_shapes=[pltpu.VMEM((tm_eff, dim_pad), jnp.float32)],
        ),
        compiler_params=pltpu.CompilerParams(
            dimension_semantics=("parallel", "arbitrary"),
            vmem_limit_bytes=vmem_limit,
        ),
        cost_estimate=cost,
    )(x2d, w1p, b1p, w2p, b2p)

    out = out[:m, :dim]
    return out.reshape(orig_shape)


def _ref_mlp(x, w1, b1, w2, b2):
    dim = x.shape[-1]
    h = x.reshape(-1, dim).astype(jnp.float32) @ w1.astype(jnp.float32) + b1.astype(jnp.float32)
    h = jax.nn.gelu(h, approximate=False)
    y = h @ w2.astype(jnp.float32) + b2.astype(jnp.float32)
    return y.reshape(x.shape)


if __name__ == "__main__":
    key = jax.random.PRNGKey(0)

    # --- Small ViT-style MLP block: (batch, seq, dim), hidden = 2*dim. ---------------
    batch, seq, dim, hidden_dim = 2, 8, 32, 64
    kx, kw1, kb1, kw2, kb2, k2 = jax.random.split(key, 6)

    x = jax.random.normal(kx, (batch, seq, dim), dtype=jnp.float32)
    # nn.Linear-style uniform(-1/sqrt(fan_in), 1/sqrt(fan_in)) init, stored pre-transposed:
    # w1 = torch_w1.T -> (dim, hidden), w2 = torch_w2.T -> (hidden, dim).
    lim1 = 1.0 / math.sqrt(dim)
    lim2 = 1.0 / math.sqrt(hidden_dim)
    w1 = jax.random.uniform(kw1, (dim, hidden_dim), jnp.float32, -lim1, lim1)
    b1 = jax.random.uniform(kb1, (hidden_dim,), jnp.float32, -lim1, lim1)
    w2 = jax.random.uniform(kw2, (hidden_dim, dim), jnp.float32, -lim2, lim2)
    b2 = jax.random.uniform(kb2, (dim,), jnp.float32, -lim2, lim2)

    y = mlp_pallas(x, w1, b1, w2, b2)
    jax.block_until_ready(y)
    y_ref = _ref_mlp(x, w1, b1, w2, b2)
    assert jnp.allclose(y, y_ref, atol=1e-5, rtol=1e-5), "f32 mismatch"

    # Row count not a multiple of the tile -> exercises the row-padding path.
    x_odd = x[:, :7, :]
    y_odd = mlp_pallas(x_odd, w1, b1, w2, b2)
    jax.block_until_ready(y_odd)
    assert jnp.allclose(y_odd, y_ref[:, :7, :], atol=1e-5, rtol=1e-5), "padded-rows mismatch"

    # bf16 operands: native bf16 MXU matmuls with f32 accumulation (looser tolerance).
    xb, w1b, b1b, w2b, b2b = (a.astype(jnp.bfloat16) for a in (x, w1, b1, w2, b2))
    yb = mlp_pallas(xb, w1b, b1b, w2b, b2b)
    jax.block_until_ready(yb)
    yb_ref = _ref_mlp(xb, w1b, b1b, w2b, b2b)
    assert jnp.allclose(yb.astype(jnp.float32), yb_ref, atol=5e-2, rtol=5e-2), "bf16 mismatch"

    # --- Larger shape to exercise the hidden-tiling accumulator (2 row x 2 hidden steps).
    dim2, hidden2, m2 = 256, 1024, 512
    kx2, kw3, kb3, kw4, kb4 = jax.random.split(k2, 5)
    x2 = jax.random.normal(kx2, (4, m2 // 4, dim2), dtype=jnp.float32)
    l1 = 1.0 / math.sqrt(dim2)
    l2 = 1.0 / math.sqrt(hidden2)
    w1_2 = jax.random.uniform(kw3, (dim2, hidden2), jnp.float32, -l1, l1)
    b1_2 = jax.random.uniform(kb3, (hidden2,), jnp.float32, -l1, l1)
    w2_2 = jax.random.uniform(kw4, (hidden2, dim2), jnp.float32, -l2, l2)
    b2_2 = jax.random.uniform(kb4, (dim2,), jnp.float32, -l2, l2)
    y2 = mlp_pallas(x2, w1_2, b1_2, w2_2, b2_2)
    jax.block_until_ready(y2)
    y2_ref = _ref_mlp(x2, w1_2, b1_2, w2_2, b2_2)
    assert jnp.allclose(y2, y2_ref, atol=2e-3, rtol=2e-3), "hidden-tiled accumulation mismatch"

    print("KERNEL_OK")
</pallas_src>

<mosaic_0001>
module attributes {stable_mosaic.version = 11 : i64} {
  func.func @mlp_kernel(%arg0: i32, %arg1: i32, %arg2: memref<16x128xf32, #tpu.memory_space<vmem>>, %arg3: memref<128x128xf32, #tpu.memory_space<vmem>>, %arg4: memref<1x128xf32, #tpu.memory_space<vmem>>, %arg5: memref<128x128xf32, #tpu.memory_space<vmem>>, %arg6: memref<1x128xf32, #tpu.memory_space<vmem>>, %arg7: memref<16x128xf32, #tpu.memory_space<vmem>>, %arg8: memref<16x128xf32, #tpu.memory_space<vmem>>) attributes {dimension_semantics = [#tpu.dimension_semantics<parallel>, #tpu.dimension_semantics<arbitrary>], iteration_bounds = array<i64: 1, 1>, scalar_prefetch = 0 : i64, scratch_operands = 1 : i64, tpu.core_type = #tpu.core_type<tc>, window_params = [{transform_indices = @transform_0, window_bounds = array<i64: 16, 128>}, {transform_indices = @transform_1, window_bounds = array<i64: 128, 128>}, {transform_indices = @transform_2, window_bounds = array<i64: 1, 128>}, {transform_indices = @transform_3, window_bounds = array<i64: 128, 128>}, {pipeline_mode = #tpu.pipeline_mode<synchronous>, transform_indices = @transform_4, window_bounds = array<i64: 1, 128>}, {transform_indices = @transform_5, window_bounds = array<i64: 16, 128>}]} {
    %c0_i32 = arith.constant 0 : i32
    %0 = arith.cmpi eq, %arg1, %c0_i32 : i32
    %1 = arith.extui %0 : i1 to i32
    %c0_i32_0 = arith.constant 0 : i32
    %2 = arith.cmpi ne, %1, %c0_i32_0 : i32
    scf.if %2 {
      %cst_18 = arith.constant 0.000000e+00 : f32
      %25 = vector.broadcast %cst_18 : f32 to vector<16x128xf32>
      %c0_19 = arith.constant 0 : index
      %c0_20 = arith.constant 0 : index
      %26 = vector.load %arg8[%c0_19, %c0_20] : memref<16x128xf32, #tpu.memory_space<vmem>>, vector<16x128xf32>
      tpu.vector_store %arg8[%c0_19, %c0_20], %25 {strides = array<i32>} : memref<16x128xf32, #tpu.memory_space<vmem>>, vector<16x128xf32>,
    } else {
    }
    %c0 = arith.constant 0 : index
    %c0_1 = arith.constant 0 : index
    %3 = vector.load %arg2[%c0, %c0_1] : memref<16x128xf32, #tpu.memory_space<vmem>>, vector<16x128xf32>
    %c0_2 = arith.constant 0 : index
    %c0_3 = arith.constant 0 : index
    %4 = vector.load %arg3[%c0_2, %c0_3] : memref<128x128xf32, #tpu.memory_space<vmem>>, vector<128x128xf32>
    %cst = arith.constant dense<0.000000e+00> : vector<16x128xf32>
    %5 = tpu.matmul %3, %4, %cst {dimension_numbers = #tpu.dot_dimension_numbers<[1], [0], [0], [1], [0, 0, 1, 1], [], []>} : vector<16x128xf32>, vector<128x128xf32>, vector<16x128xf32> -> vector<16x128xf32>
    %c0_4 = arith.constant 0 : index
    %c0_5 = arith.constant 0 : index
    %6 = vector.load %arg4[%c0_4, %c0_5] : memref<1x128xf32, #tpu.memory_space<vmem>>, vector<1x128xf32>
    %7 = vector.broadcast %6 : vector<1x128xf32> to vector<16x128xf32>
    %8 = arith.addf %5, %7 : vector<16x128xf32>
    %cst_6 = arith.constant 5.000000e-01 : f32
    %9 = vector.broadcast %cst_6 : f32 to vector<16x128xf32>
    %10 = arith.mulf %9, %8 : vector<16x128xf32>
    %cst_7 = arith.constant 0.707106769 : f32
    %11 = vector.broadcast %cst_7 : f32 to vector<16x128xf32>
    %12 = arith.mulf %8, %11 : vector<16x128xf32>
    %13 = math.erf %12 : vector<16x128xf32>
    %cst_8 = arith.constant 1.000000e+00 : f32
    %14 = vector.broadcast %cst_8 : f32 to vector<16x128xf32>
    %15 = arith.addf %14, %13 : vector<16x128xf32>
    %16 = arith.mulf %10, %15 : vector<16x128xf32>
    %c0_9 = arith.constant 0 : index
    %c0_10 = arith.constant 0 : index
    %17 = vector.load %arg8[%c0_9, %c0_10] : memref<16x128xf32, #tpu.memory_space<vmem>>, vector<16x128xf32>
    %c0_11 = arith.constant 0 : index
    %c0_12 = arith.constant 0 : index
    %18 = vector.load %arg5[%c0_11, %c0_12] : memref<128x128xf32, #tpu.memory_space<vmem>>, vector<128x128xf32>
    %cst_13 = arith.constant dense<0.000000e+00> : vector<16x128xf32>
    %19 = tpu.matmul %16, %18, %cst_13 {dimension_numbers = #tpu.dot_dimension_numbers<[1], [0], [0], [1], [0, 0, 1, 1], [], []>} : vector<16x128xf32>, vector<128x128xf32>, vector<16x128xf32> -> vector<16x128xf32>
    %20 = arith.addf %17, %19 : vector<16x128xf32>
    %c0_14 = arith.constant 0 : index
    %c0_15 = arith.constant 0 : index
    %21 = vector.load %arg8[%c0_14, %c0_15] : memref<16x128xf32, #tpu.memory_space<vmem>>, vector<16x128xf32>
    tpu.vector_store %arg8[%c0_14, %c0_15], %20 {strides = array<i32>} : memref<16x128xf32, #tpu.memory_space<vmem>>, vector<16x128xf32>,
    %c0_i32_16 = arith.constant 0 : i32
    %22 = arith.cmpi eq, %arg1, %c0_i32_16 : i32
    %23 = arith.extui %22 : i1 to i32
    %c0_i32_17 = arith.constant 0 : i32
    %24 = arith.cmpi ne, %23, %c0_i32_17 : i32
    scf.if %24 {
      %c0_18 = arith.constant 0 : index
      %c0_19 = arith.constant 0 : index
      %25 = vector.load %arg8[%c0_18, %c0_19] : memref<16x128xf32, #tpu.memory_space<vmem>>, vector<16x128xf32>
      %c0_20 = arith.constant 0 : index
      %c0_21 = arith.constant 0 : index
      %26 = vector.load %arg6[%c0_20, %c0_21] : memref<1x128xf32, #tpu.memory_space<vmem>>, vector<1x128xf32>
      %27 = vector.broadcast %26 : vector<1x128xf32> to vector<16x128xf32>
      %28 = arith.addf %25, %27 : vector<16x128xf32>
      %c0_22 = arith.constant 0 : index
      %c0_23 = arith.constant 0 : index
      %29 = vector.load %arg7[%c0_22, %c0_23] : memref<16x128xf32, #tpu.memory_space<vmem>>, vector<16x128xf32>
      tpu.vector_store %arg7[%c0_22, %c0_23], %28 {strides = array<i32>} : memref<16x128xf32, #tpu.memory_space<vmem>>, vector<16x128xf32>,
    } else {
    }
    return
  }
  func.func @transform_0(%arg0: i32, %arg1: i32) -> (i32, i32) {
    %c0_i32 = arith.constant 0 : i32
    %c0_i32_0 = arith.constant 0 : i32
    return %arg0, %c0_i32 : i32, i32
  }
  func.func @transform_1(%arg0: i32, %arg1: i32) -> (i32, i32) {
    %c0_i32 = arith.constant 0 : i32
    %c0_i32_0 = arith.constant 0 : i32
    return %c0_i32, %arg1 : i32, i32
  }
  func.func @transform_2(%arg0: i32, %arg1: i32) -> (i32, i32) {
    %c0_i32 = arith.constant 0 : i32
    %c0_i32_0 = arith.constant 0 : i32
    return %c0_i32, %arg1 : i32, i32
  }
  func.func @transform_3(%arg0: i32, %arg1: i32) -> (i32, i32) {
    %c0_i32 = arith.constant 0 : i32
    %c0_i32_0 = arith.constant 0 : i32
    return %arg1, %c0_i32 : i32, i32
  }
  func.func @transform_4(%arg0: i32, %arg1: i32) -> (i32, i32) {
    %c0_i32 = arith.constant 0 : i32
    %c0_i32_0 = arith.constant 0 : i32
    %c0_i32_1 = arith.constant 0 : i32
    return %c0_i32, %c0_i32_0 : i32, i32
  }
  func.func @transform_5(%arg0: i32, %arg1: i32) -> (i32, i32) {
    %c0_i32 = arith.constant 0 : i32
    %c0_i32_0 = arith.constant 0 : i32
    return %arg0, %c0_i32 : i32, i32
  }
}

</mosaic_0001>

<bundles_post_ra>
// kernel: tpu_custom_call.1
= control target key start
LH: loop header
LB: loop body
LE: loop exit
PB: predicated region body
PF: predicated region fallthrough
CT: control target
= control target key end

     0   :  { %10 = vsyncpa [#allocation4], 0  ;;  %s694_s0 = inlined_call_operand.hbm [shape: f32[16,128], index: 0, kind: input, shape index: {}]   ;;  %s695_s1 = inlined_call_operand.hbm [shape: f32[128,128], index: 1, kind: input, shape index: {}]   ;;  %s696_s2 = inlined_call_operand.vmem [shape: f32[1,128], index: 2, kind: input, shape index: {}]   ;;  %s697_s3 = inlined_call_operand.hbm [shape: f32[128,128], index: 3, kind: input, shape index: {}]   ;;  %s698_s4 = inlined_call_operand.vmem [shape: f32[1,128], index: 4, kind: input, shape index: {}]   ;;  %s699_s5 = inlined_call_operand.hbm [shape: f32[16,128], index: 5, kind: output, shape index: {}]  }
   0x1   :  { %11 = vsyncpa [#allocation7], 0 }
   0x2   :  { %12 = vsyncpa [#allocation5], 0  ;;  %s585_s18 = smov [#allocation6]   ;;  %s586_s20 = smov [#allocation3]  }
   0x3   :  { %s30_s19 = sshll.u32 %s585_s18, 4  ;;  %s18_s21 = sshll.u32 %s586_s20, 4  ;;  %s31_s19 = int_to_ptr.vmem [resolvable:$true] %s30_s19  ;;  %s621_s21 = int_to_ptr.vmem [resolvable:$true] %s18_s21 }
   0x4   :  { %s491_s24 = scalar_lea.hbm %s695_s1, 2048 }
   0x5   :  { %p492_p0 = scmp.ne.s32.totalorder %s695_s1, %s491_s24  ;;  %p495_p1 = scmp.lt.u32.totalorder %s491_s24, %s695_s1 }
   0x7   :  { %p497_p2 = pnand %p495_p1, %p492_p0 }
   0x9   :  { %500 = shalt.err (!%p497_p2)
}
   0xa   :  { %s501_s29 = scalar_lea.vmem %s31_s19, 2048  ;;  %p506_p4 = scmp.lt.s32.totalorder %s31_s19, %s31_s19 }
   0xb   :  { %p502_p3 = scmp.ne.s32.totalorder %s31_s19, %s501_s29  ;;  %p507_p5 = scmp.lt.s32.totalorder %s501_s29, %s501_s29 }
   0xd   :  { %p508_p6 = por %p507_p5, %p506_p4 }
   0xf   :  { %p509_p7 = pnand %p508_p6, %p502_p3 }
  0x11   :  { %512 = shalt.err (!%p509_p7)
}
  0x12   :  { %s587_s30 = smov 128   ;;  %s588_s6 = smov 8  }
  0x13   :  { %36 = dma.hbm_to_vmem [thread:$0]  %s695_s1, 2048, %s31_s19, [#allocation7], %s587_s30, %s587_s30, %s588_s6  }
  0x14   :  { %s513_s11 = scalar_lea.hbm %s694_s0, 256 }
  0x15   :  { %p514_p8 = scmp.ne.s32.totalorder %s694_s0, %s513_s11  ;;  %p517_p9 = scmp.lt.u32.totalorder %s513_s11, %s694_s0 }
  0x17   :  { %p519_p10 = pnand %p517_p9, %p514_p8 }
  0x19   :  { %522 = shalt.err (!%p519_p10)
}
  0x1a   :  { %s523_s16 = scalar_lea.vmem %s621_s21, 256  ;;  %p528_p12 = scmp.lt.s32.totalorder %s621_s21, %s621_s21 }
  0x1b   :  { %p524_p11 = scmp.ne.s32.totalorder %s621_s21, %s523_s16  ;;  %p529_p13 = scmp.lt.s32.totalorder %s523_s16, %s523_s16 }
  0x1d   :  { %p530_p0 = por %p529_p13, %p528_p12 }
  0x1f   :  { %p531_p1 = pnand %p530_p0, %p524_p11 }
  0x21   :  { %534 = shalt.err (!%p531_p1)
}
  0x22   :  { %24 = dma.hbm_to_vmem [thread:$0]  %s694_s0, 256, %s621_s21, [#allocation4], %s587_s30, %s587_s30, %s588_s6  }
  0x23   :  { %s589_s18 = smov [#allocation8]   ;;  %s535_s23 = scalar_lea.hbm %s697_s3, 2048 }
  0x24   :  { %s44_s19 = sshll.u32 %s589_s18, 4  ;;  %p536_p2 = scmp.ne.s32.totalorder %s697_s3, %s535_s23  ;;  %s45_s19 = int_to_ptr.vmem [resolvable:$true] %s44_s19 }
  0x25   :  { %p539_p3 = scmp.lt.u32.totalorder %s535_s23, %s697_s3 }
  0x27   :  { %p541_p4 = pnand %p539_p3, %p536_p2 }
  0x29   :  { %544 = shalt.err (!%p541_p4)
}
  0x2a   :  { %s545_s28 = scalar_lea.vmem %s45_s19, 2048  ;;  %p550_p6 = scmp.lt.s32.totalorder %s45_s19, %s45_s19 }
  0x2b   :  { %p546_p5 = scmp.ne.s32.totalorder %s45_s19, %s545_s28  ;;  %p551_p7 = scmp.lt.s32.totalorder %s545_s28, %s545_s28 }
  0x2d   :  { %p552_p8 = por %p551_p7, %p550_p6 }
  0x2f   :  { %p553_p9 = pnand %p552_p8, %p546_p5 }
  0x31   :  { %556 = shalt.err (!%p553_p9)
}
  0x32   :  { %50 = dma.hbm_to_vmem [thread:$0]  %s697_s3, 2048, %s45_s19, [#allocation7], %s587_s30, %s587_s30, %s588_s6  }
  0x33   :  { %579 = dma.done.wait [#allocation4], 256  }
  0x34   :  { %580 = vsyncadd [#allocation4], 4294967040 }
  0x35   :  { %581 = dma.done.wait [#allocation7], 4096  }
  0x36   :  { %582 = vsyncadd [#allocation7], 4294963200  ;;  %v70_v0 = vld [vmem:[#allocation6] sm:$0xff]  ;;  %v71_v1 = vld [vmem:[#allocation6 + $0x8] sm:$0xff]  ;;  %s590_s8 = smov [#allocation9]  }
  0x37   :  { %v72_v2 = vld [vmem:[#allocation6 + $0x10] sm:$0xff]  ;;  %v417_v3 = vpack.c.bf16 %v71_v1, %v70_v0  ;;  %v73_v4 = vld [vmem:[#allocation6 + $0x18] sm:$0xff]  ;;  %v74_v6 = vld [vmem:[#allocation6 + $0x20] sm:$0xff]  ;;  %s296_s9 = sshll.u32 %s590_s8, 4  ;;  %s297_s9 = int_to_ptr.vmem [resolvable:$true] %s296_s9 }
  0x38   :  { %v421_v5 = vpack.c.bf16 %v73_v4, %v72_v2  ;;  %v75_v7 = vld [vmem:[#allocation6 + $0x28] sm:$0xff]  ;;  %v76_v9 = vld [vmem:[#allocation6 + $0x30] sm:$0xff]  ;;  %v77_v10 = vld [vmem:[#allocation6 + $0x38] sm:$0xff]  ;;  %s557_s10 = scalar_lea.vmem %s297_s9, 256  ;;  %p562_p11 = scmp.lt.s32.totalorder %s297_s9, %s297_s9 }
  0x39   :  { %418 = vmatprep.subr.bf16.mxu0 %v417_v3  ;;  %v425_v8 = vpack.c.bf16 %v75_v7, %v74_v6  ;;  %v68_v11 = vld [vmem:[#allocation3] sm:$0xff]  ;;  %v180_v12 = vld [vmem:[#allocation8] sm:$0xff]  ;;  %v181_v13 = vld [vmem:[#allocation8 + $0x8] sm:$0xff]  ;;  %v429_v20 = vpack.c.bf16 %v77_v10, %v76_v9  ;;  %p558_p10 = scmp.ne.s32.totalorder %s297_s9, %s557_s10  ;;  %p563_p12 = scmp.lt.s32.totalorder %s557_s10, %s557_s10 }
  0x3a   :  { %420 = vmatpush3.bf16.msra.mxu0 %v417_v3  ;;  %379 = vmatprep.mubr.f32.mxu0 %v68_v11  ;;  %v182_v14 = vld [vmem:[#allocation8 + $0x10] sm:$0xff]  ;;  %v449_v15 = vpack.c.bf16 %v181_v13, %v180_v12  ;;  %v183_v16 = vld [vmem:[#allocation8 + $0x18] sm:$0xff]  ;;  %v184_v18 = vld [vmem:[#allocation8 + $0x20] sm:$0xff] }
  0x3b   :  { %422 = vmatprep.subr.bf16.mxu0 %v421_v5  ;;  %v453_v17 = vpack.c.bf16 %v183_v16, %v182_v14  ;;  %v185_v19 = vld [vmem:[#allocation8 + $0x28] sm:$0xff]  ;;  %v78_v21 = vld [vmem:[#allocation6 + $0x40] sm:$0xff]  ;;  %v80_v25 = vld [vmem:[#allocation6 + $0x50] sm:$0xff]  ;;  %p564_p13 = por %p563_p12, %p562_p11 }
  0x3c   :  { %450 = vmatprep.subr.bf16.mxu1 %v449_v15  ;;  %v79_v22 = vld [vmem:[#allocation6 + $0x48] sm:$0xff]  ;;  %v457_v23 = vpack.c.bf16 %v185_v19, %v184_v18  ;;  %v81_v26 = vld [vmem:[#allocation6 + $0x58] sm:$0xff]  ;;  %v82_v28 = vld [vmem:[#allocation6 + $0x60] sm:$0xff] }
  0x3d   :  { %452 = vmatpush3.bf16.msra.mxu1 %v449_v15  ;;  %v433_v24 = vpack.c.bf16 %v79_v22, %v78_v21  ;;  %v437_v27 = vpack.c.bf16 %v81_v26, %v80_v25  ;;  %v83_v29 = vld [vmem:[#allocation6 + $0x68] sm:$0xff]  ;;  %v84_v31 = vld [vmem:[#allocation6 + $0x70] sm:$0xff]  ;;  %v85_v32 = vld [vmem:[#allocation6 + $0x78] sm:$0xff]  ;;  %p565_p0 = pnand %p564_p13, %p558_p10 }
  0x3e   :  { %424 = vmatpush3.bf16.msra.mxu0 %v421_v5  ;;  %454 = vmatprep.subr.bf16.mxu1 %v453_v17  ;;  %v441_v30 = vpack.c.bf16 %v83_v29, %v82_v28  ;;  %v445_v33 = vpack.c.bf16 %v85_v32, %v84_v31  ;;  %v69_v34 = vld [vmem:[#allocation3 + $0x8] sm:$0xff]  ;;  %v186_v35 = vld [vmem:[#allocation8 + $0x30] sm:$0xff]  ;;  %v188_v38 = vld [vmem:[#allocation8 + $0x40] sm:$0xff] }
  0x3f   :  { %426 = vmatprep.subr.bf16.mxu0 %v425_v8  ;;  %v187_v36 = vld [vmem:[#allocation8 + $0x38] sm:$0xff]  ;;  %v189_v39 = vld [vmem:[#allocation8 + $0x48] sm:$0xff]  ;;  %v190_v41 = vld [vmem:[#allocation8 + $0x50] sm:$0xff] }
  0x40   :  { %v461_v37 = vpack.c.bf16 %v187_v36, %v186_v35  ;;  %v465_v40 = vpack.c.bf16 %v189_v39, %v188_v38  ;;  %v191_v42 = vld [vmem:[#allocation8 + $0x58] sm:$0xff]  ;;  %v192_v44 = vld [vmem:[#allocation8 + $0x60] sm:$0xff]  ;;  %v193_v45 = vld [vmem:[#allocation8 + $0x68] sm:$0xff] }
  0x41   :  { %456 = vmatpush3.bf16.msra.mxu1 %v453_v17  ;;  %v469_v43 = vpack.c.bf16 %v191_v42, %v190_v41  ;;  %v473_v46 = vpack.c.bf16 %v193_v45, %v192_v44  ;;  %v194_v47 = vld [vmem:[#allocation8 + $0x70] sm:$0xff]  ;;  %v195_v48 = vld [vmem:[#allocation8 + $0x78] sm:$0xff] }
  0x42   :  { %428 = vmatpush3.bf16.msra.mxu0 %v425_v8  ;;  %458 = vmatprep.subr.bf16.mxu1 %v457_v23  ;;  %v477_v49 = vpack.c.bf16 %v195_v48, %v194_v47  ;;  %v309_v50 = vld [vmem:[%s696_s2] ss:$0 sm:$0xff] }
  0x43   :  { %430 = vmatprep.subr.bf16.mxu0 %v429_v20  ;;  %v310_v1 = vld [vmem:[%s698_s4] ss:$0 sm:$0xff] }
  0x45   :  { %460 = vmatpush3.bf16.msra.mxu1 %v457_v23 }
  0x46   :  { %432 = vmatpush3.bf16.msra.mxu0 %v429_v20  ;;  %462 = vmatprep.subr.bf16.mxu1 %v461_v37 }
  0x47   :  { %434 = vmatprep.subr.bf16.mxu0 %v433_v24 }
  0x49   :  { %464 = vmatpush3.bf16.msra.mxu1 %v461_v37 }
  0x4a   :  { %436 = vmatpush3.bf16.msra.mxu0 %v433_v24  ;;  %466 = vmatprep.subr.bf16.mxu1 %v465_v40 }
  0x4b   :  { %438 = vmatprep.subr.bf16.mxu0 %v437_v27 }
  0x4d   :  { %468 = vmatpush3.bf16.msra.mxu1 %v465_v40 }
  0x4e   :  { %440 = vmatpush3.bf16.msra.mxu0 %v437_v27  ;;  %470 = vmatprep.subr.bf16.mxu1 %v469_v43 }
  0x4f   :  { %442 = vmatprep.subr.bf16.mxu0 %v441_v30 }
  0x51   :  { %472 = vmatpush3.bf16.msra.mxu1 %v469_v43 }
  0x52   :  { %444 = vmatpush3.bf16.msra.mxu0 %v441_v30  ;;  %474 = vmatprep.subr.bf16.mxu1 %v473_v46 }
  0x53   :  { %446 = vmatprep.subr.bf16.mxu0 %v445_v33 }
  0x55   :  { %476 = vmatpush3.bf16.msra.mxu1 %v473_v46 }
  0x56   :  { %448 = vmatpush3.bf16.msra.mxu0 %v445_v33  ;;  %478 = vmatprep.subr.bf16.mxu1 %v477_v49 }
  0x59   :  { %380 = vmatmul.mubr.f32.vlgmr.msra.gmra.mrb[0].mxu0 %v69_v34  ;;  %480 = vmatpush3.bf16.msra.mxu1 %v477_v49 }
 0x12c   :  { %v381_v51 = vpop.f32.mrb[0].mxu0 }
 0x12d   :  { %v165_v52 = vadd.f32 %v381_v51, %v309_v50  ;;  %v159_v53 = vpop.f32.mrb[1].mxu0 }
 0x12e   :  { %v160_v54 = vadd.f32 %v309_v50, %v159_v53 }
 0x12f   :  { %v171_v55 = vmul.f32 0.70710677, %v165_v52  ;;  %v169_v62 = vmul.f32 0.5, %v165_v52 }
 0x130   :  { %v170_v56 = vmul.f32 0.70710677, %v160_v54  ;;  %v168_v60 = vmul.f32 0.5, %v160_v54 }
 0x131   :  { %487 = verf.f32 %v171_v55 }
 0x132   :  { %489 = verf.f32 %v170_v56 }
 0x13b   :  { %v488_v57 = vpop.eup %487 }
 0x13c   :  { %v490_v58 = vpop.eup %489  ;;  %v175_v59 = vadd.f32 1.0, %v488_v57 }
 0x13d   :  { %v174_v61 = vadd.f32 1.0, %v490_v58 }
 0x13e   :  { %v177_v0 = vmul.f32 %v175_v59, %v169_v62 }
 0x13f   :  { %v176_v63 = vmul.f32 %v174_v61, %v168_v60 }
 0x141   :  { %414 = vmatprep.mubr.f32.mxu1 %v176_v63 }
 0x142   :  { %415 = vmatmul.mubr.f32.vlgmr.msra.gmra.mrb[0].mxu1 %v177_v0 }
 0x215   :  { %v416_v2 = vpop.f32.mrb[0].mxu1 }
 0x216   :  { %v288_v3 = vadd.f32 %v416_v2, %v310_v1  ;;  %v262_v4 = vpop.f32.mrb[1].mxu1 }
 0x217   :  { %v287_v5 = vadd.f32 %v310_v1, %v262_v4 }
 0x218   :  { %290 = vst [vmem:[#allocation9 + $0x8] sm:$0xff] %v288_v3 }
 0x219   :  { %289 = vst [vmem:[#allocation9] sm:$0xff] %v287_v5 }
 0x21a   :  { %568 = shalt.err (!%p565_p0)
}
 0x21b   :  { %s569_s4 = scalar_lea.hbm %s699_s5, 256 }
 0x21c   :  { %p570_p1 = scmp.ne.s32.totalorder %s699_s5, %s569_s4  ;;  %p573_p2 = scmp.lt.u32.totalorder %s569_s4, %s699_s5 }
 0x21e   :  { %p575_p3 = pnand %p573_p2, %p570_p1 }
 0x220   :  { %578 = shalt.err (!%p575_p3)
}
 0x221   :  { %302 = dma.vmem_to_hbm [thread:$0]  %s297_s9, 256, %s699_s5, [#allocation5], %s587_s30, %s587_s30, %s588_s6  }
 0x222   :  { %583 = dma.done.wait [#allocation5], 256  }
 0x223   :  { %584 = vsyncadd [#allocation5], 4294967040 }
 0x224   :  { %306 = vsyncpa [#allocation4], 1 }
 0x225   :  { %307 = vsyncpa [#allocation7], 1 }
 0x226   :  { %308 = vsyncpa [#allocation5], 1 }

</bundles_post_ra>
